<compile_context>
chip_gen: v7x
topology: tpu7x:2x2x1
jax: 0.10.0
libtpu: 0.0.40
codegen_flags: <defaults>
</compile_context>

<pallas_src>
import functools
import math

import jax
import jax.numpy as jnp
from jax.experimental import pallas as pl
from jax.experimental.pallas import tpu as pltpu


def _round_up(x, m):
    return ((x + m - 1) // m) * m


def _llada_regressor_kernel(x_ref, w1_ref, b1_ref, w2_ref, b2_ref, o_ref, acc_ref,
                            *, approximate_gelu):
    """Grid = (batch tile i, K tile k).

    Each step accumulates a (block_b, tk) @ (tk, H) partial product into an f32
    scratch; bias + GELU + the H->1 projection happen on the last K step only.
    """
    k = pl.program_id(1)

    @pl.when(k == 0)
    def _():
        acc_ref[...] = jnp.zeros_like(acc_ref)

    # MXU matmul with f32 accumulation (inputs may be bf16).
    acc_ref[...] += jnp.dot(x_ref[...], w1_ref[...],
                            preferred_element_type=jnp.float32)

    @pl.when(k == pl.num_programs(1) - 1)
    def _():
        h = acc_ref[...] + b1_ref[...].astype(jnp.float32)            # [bm, H]
        if approximate_gelu:
            # tanh approximation -> EUP (opt-in; slightly different numerics
            # from torch.nn.GELU() default).
            c = jnp.float32(math.sqrt(2.0 / math.pi))
            h = 0.5 * h * (1.0 + jnp.tanh(c * (h + 0.044715 * h * h * h)))
        else:
            # Exact erf-based GELU, matching torch.nn.GELU() default.
            inv_sqrt2 = jnp.float32(1.0 / math.sqrt(2.0))
            h = 0.5 * h * (1.0 + jax.lax.erf(h * inv_sqrt2))
        # Second linear (out_features == 1): VPU multiply + lane reduction
        # instead of an N=1 MXU matmul.
        w2_row = w2_ref[...].astype(jnp.float32)                       # [1, H]
        y = jnp.sum(h * w2_row, axis=-1, keepdims=True) + b2_ref[0, 0]
        o_ref[...] = y.astype(o_ref.dtype)


def llada_regressor(pooled, w1, b1, w2, b2, *, block_b=None, block_k=512,
                    cast_to_bf16=True, approximate_gelu=False):
    """pooled: [B, D] -> [B].   w1: [D, H], b1: [1, H], w2: [1, H], b2: [1, 1]."""
    assert pooled.ndim == 2, f"Expected [B, D], got {pooled.shape}"
    B, D = pooled.shape
    H = w1.shape[1]
    assert w1.shape == (D, H) and b1.shape == (1, H)
    assert w2.shape == (1, H) and b2.shape == (1, 1)

    if cast_to_bf16:
        # bf16 halves the dominant W1 / x HBM traffic and feeds the bf16 MXU;
        # accumulation stays f32 inside the kernel.
        pooled = pooled.astype(jnp.bfloat16)
        w1 = w1.astype(jnp.bfloat16)

    # ---- Batch tiling: multiple-of-8 tiles (256 is a multiple of 128 for MXU). ----
    if block_b is None:
        block_b = min(256, _round_up(B, 8))
    block_b = max(8, _round_up(block_b, 8))
    B_pad = _round_up(B, block_b)
    if B_pad != B:
        pooled = jnp.pad(pooled, ((0, B_pad - B), (0, 0)))
    n_b = B_pad // block_b

    # ---- K tiling over D: stream W1 in (tk, H) chunks, pipelined vs. MXU. ----
    if D <= block_k:
        tk, D_pad = D, D                       # single K step, full-dim block
    else:
        tk = None
        top = block_k - (block_k % 128)
        for cand in range(top, 127, -128):     # largest multiple of 128 dividing D
            if D % cand == 0:
                tk = cand
                break
        if tk is None:                         # no divisor: pad D with zeros
            tk = max(128, top)
        D_pad = _round_up(D, tk)
    if D_pad != D:
        # Zero-padded K columns contribute nothing to the accumulation.
        pooled = jnp.pad(pooled, ((0, 0), (0, D_pad - D)))
        w1 = jnp.pad(w1, ((0, D_pad - D), (0, 0)))
    n_k = D_pad // tk

    x_item = pooled.dtype.itemsize
    w_item = w1.dtype.itemsize

    # ---- Capacity-aware VMEM budget (v5e/v6e: 128 MiB, v7x: 64 MiB). ----
    try:
        vmem_cap = int(getattr(pltpu.get_tpu_info(), "vmem_capacity_bytes",
                               64 << 20))
    except Exception:
        vmem_cap = 64 << 20
    need = (2 * block_b * tk * x_item          # x tile, double-buffered
            + 2 * tk * H * w_item              # W1 tile, double-buffered
            + 2 * block_b * 4                  # output tile
            + 4 * H * 4                        # b1 + w2 rows (resident)
            + block_b * H * 4                  # f32 accumulator scratch
            + 4 * block_b * H * 4)             # GELU / elementwise temps
    vmem_limit = int(max(16 << 20, min(need + (8 << 20), vmem_cap - (8 << 20))))

    # ---- Megacore: only batch-parallel when compute-bound with >=2 tiles/core. ----
    batch_sem = "parallel" if n_b >= 4 else "arbitrary"

    cost = pl.CostEstimate(
        flops=2 * B_pad * D_pad * H + 2 * B_pad * H,
        transcendentals=B_pad * H,
        bytes_accessed=(B_pad * D_pad * x_item + D_pad * H * w_item
                        + 2 * H * 4 + B_pad * 4),
    )

    kernel = functools.partial(_llada_regressor_kernel,
                               approximate_gelu=approximate_gelu)

    out = pl.pallas_call(
        kernel,
        out_shape=jax.ShapeDtypeStruct((B_pad, 1), jnp.float32),
        grid_spec=pltpu.PrefetchScalarGridSpec(
            num_scalar_prefetch=0,
            grid=(n_b, n_k),
            in_specs=[
                pl.BlockSpec((block_b, tk), lambda i, k: (i, k)),   # x tile
                pl.BlockSpec((tk, H), lambda i, k: (k, 0)),         # W1 stream
                pl.BlockSpec((1, H), lambda i, k: (0, 0)),          # b1 (resident)
                pl.BlockSpec((1, H), lambda i, k: (0, 0)),          # w2 row
                pl.BlockSpec(memory_space=pltpu.MemorySpace.SMEM),  # b2 scalar
            ],
            out_specs=pl.BlockSpec((block_b, 1), lambda i, k: (i, 0)),
            scratch_shapes=[pltpu.VMEM((block_b, H), jnp.float32)],
        ),
        compiler_params=pltpu.CompilerParams(
            dimension_semantics=(batch_sem, "arbitrary"),
            vmem_limit_bytes=vmem_limit,
        ),
        cost_estimate=cost,
    )(pooled, w1, b1, w2, b2)

    return out[:B, 0]   # drop batch padding, squeeze(-1) -> [B]


def init_params(hidden_size, key):
    """Deterministic init mimicking torch.nn.Linear default (U(-1/sqrt(fan_in), +))."""
    half = hidden_size // 2
    k1, k2, k3, k4 = jax.random.split(key, 4)
    bound1 = 1.0 / math.sqrt(hidden_size)
    bound2 = 1.0 / math.sqrt(half)
    w1 = jax.random.uniform(k1, (hidden_size, half), jnp.float32, -bound1, bound1)
    b1 = jax.random.uniform(k2, (1, half), jnp.float32, -bound1, bound1)
    w2 = jax.random.uniform(k3, (1, half), jnp.float32, -bound2, bound2)  # PyTorch [1, H]
    b2 = jax.random.uniform(k4, (1, 1), jnp.float32, -bound2, bound2)
    return w1, b1, w2, b2


def _reference(pooled, w1, b1, w2, b2):
    h = pooled @ w1 + b1
    h = 0.5 * h * (1.0 + jax.lax.erf(h / jnp.float32(math.sqrt(2.0))))
    return (h @ w2.T + b2)[:, 0]


if __name__ == "__main__":
    key = jax.random.PRNGKey(0)
    kx1, kp1, kx2, kp2 = jax.random.split(key, 4)

    # Case 1: exact f32 path, tiny shapes (B=6 exercises batch padding).
    B, D = 6, 32
    pooled = jax.random.normal(kx1, (B, D), jnp.float32)
    w1, b1, w2, b2 = init_params(D, kp1)
    out = jax.block_until_ready(
        llada_regressor(pooled, w1, b1, w2, b2, cast_to_bf16=False))
    ref = _reference(pooled, w1, b1, w2, b2)
    assert out.shape == (B,), out.shape
    assert jnp.allclose(out, ref, atol=1e-5, rtol=1e-5), (out, ref)

    # Case 2: default bf16 path with multiple batch tiles and K tiles
    # (exercises the accumulator / pl.when epilogue and batch + K padding).
    B2, D2 = 20, 256
    pooled2 = jax.random.normal(kx2, (B2, D2), jnp.float32)
    w1b, b1b, w2b, b2b = init_params(D2, kp2)
    out2 = jax.block_until_ready(
        llada_regressor(pooled2, w1b, b1b, w2b, b2b, block_b=8, block_k=128))
    ref2 = _reference(pooled2, w1b, b1b, w2b, b2b)
    assert out2.shape == (B2,), out2.shape
    assert jnp.allclose(out2, ref2, atol=5e-2, rtol=5e-2), (out2, ref2)

    print("KERNEL_OK")
</pallas_src>

<mosaic_0001>
module attributes {stable_mosaic.version = 11 : i64} {
  func.func @_llada_regressor_kernel(%arg0: i32, %arg1: i32, %arg2: memref<8x32xf32, #tpu.memory_space<vmem>>, %arg3: memref<32x16xf32, #tpu.memory_space<vmem>>, %arg4: memref<1x16xf32, #tpu.memory_space<vmem>>, %arg5: memref<1x16xf32, #tpu.memory_space<vmem>>, %arg6: memref<1x1xf32, #tpu.memory_space<smem>>, %arg7: memref<8x1xf32, #tpu.memory_space<vmem>>, %arg8: memref<8x16xf32, #tpu.memory_space<vmem>>) attributes {dimension_semantics = [#tpu.dimension_semantics<arbitrary>, #tpu.dimension_semantics<arbitrary>], iteration_bounds = array<i64: 1, 1>, scalar_prefetch = 0 : i64, scratch_operands = 1 : i64, tpu.core_type = #tpu.core_type<tc>, window_params = [{transform_indices = @transform_0, window_bounds = array<i64: 8, 32>}, {transform_indices = @transform_1, window_bounds = array<i64: 32, 16>}, {pipeline_mode = #tpu.pipeline_mode<synchronous>, transform_indices = @transform_2, window_bounds = array<i64: 1, 16>}, {pipeline_mode = #tpu.pipeline_mode<synchronous>, transform_indices = @transform_3, window_bounds = array<i64: 1, 16>}, {transform_indices = @transform_4, window_bounds = array<i64: 1, 1>}, {transform_indices = @transform_5, window_bounds = array<i64: 8, 1>}]} {
    %c0_i32 = arith.constant 0 : i32
    %0 = arith.cmpi eq, %arg1, %c0_i32 : i32
    %1 = arith.extui %0 : i1 to i32
    %c0_i32_0 = arith.constant 0 : i32
    %2 = arith.cmpi ne, %1, %c0_i32_0 : i32
    scf.if %2 {
      %cst_10 = arith.constant 0.000000e+00 : f32
      %12 = vector.broadcast %cst_10 : f32 to vector<8x16xf32>
      %c0_11 = arith.constant 0 : index
      %c0_12 = arith.constant 0 : index
      %13 = vector.load %arg8[%c0_11, %c0_12] : memref<8x16xf32, #tpu.memory_space<vmem>>, vector<8x16xf32>
      tpu.vector_store %arg8[%c0_11, %c0_12], %12 {strides = array<i32>} : memref<8x16xf32, #tpu.memory_space<vmem>>, vector<8x16xf32>,
    } else {
    }
    %c0 = arith.constant 0 : index
    %c0_1 = arith.constant 0 : index
    %3 = vector.load %arg8[%c0, %c0_1] : memref<8x16xf32, #tpu.memory_space<vmem>>, vector<8x16xf32>
    %c0_2 = arith.constant 0 : index
    %c0_3 = arith.constant 0 : index
    %4 = vector.load %arg2[%c0_2, %c0_3] : memref<8x32xf32, #tpu.memory_space<vmem>>, vector<8x32xf32>
    %c0_4 = arith.constant 0 : index
    %c0_5 = arith.constant 0 : index
    %5 = vector.load %arg3[%c0_4, %c0_5] : memref<32x16xf32, #tpu.memory_space<vmem>>, vector<32x16xf32>
    %cst = arith.constant dense<0.000000e+00> : vector<8x16xf32>
    %6 = tpu.matmul %4, %5, %cst {dimension_numbers = #tpu.dot_dimension_numbers<[1], [0], [0], [1], [0, 0, 1, 1], [], []>} : vector<8x32xf32>, vector<32x16xf32>, vector<8x16xf32> -> vector<8x16xf32>
    %7 = arith.addf %3, %6 : vector<8x16xf32>
    %c0_6 = arith.constant 0 : index
    %c0_7 = arith.constant 0 : index
    %8 = vector.load %arg8[%c0_6, %c0_7] : memref<8x16xf32, #tpu.memory_space<vmem>>, vector<8x16xf32>
    tpu.vector_store %arg8[%c0_6, %c0_7], %7 {strides = array<i32>} : memref<8x16xf32, #tpu.memory_space<vmem>>, vector<8x16xf32>,
    %c0_i32_8 = arith.constant 0 : i32
    %9 = arith.cmpi eq, %arg1, %c0_i32_8 : i32
    %10 = arith.extui %9 : i1 to i32
    %c0_i32_9 = arith.constant 0 : i32
    %11 = arith.cmpi ne, %10, %c0_i32_9 : i32
    scf.if %11 {
      %c0_10 = arith.constant 0 : index
      %c0_11 = arith.constant 0 : index
      %12 = vector.load %arg8[%c0_10, %c0_11] : memref<8x16xf32, #tpu.memory_space<vmem>>, vector<8x16xf32>
      %c0_12 = arith.constant 0 : index
      %c0_13 = arith.constant 0 : index
      %13 = vector.load %arg4[%c0_12, %c0_13] : memref<1x16xf32, #tpu.memory_space<vmem>>, vector<1x16xf32>
      %14 = vector.broadcast %13 : vector<1x16xf32> to vector<8x16xf32>
      %15 = arith.addf %12, %14 : vector<8x16xf32>
      %cst_14 = arith.constant 5.000000e-01 : f32
      %16 = vector.broadcast %cst_14 : f32 to vector<8x16xf32>
      %17 = arith.mulf %16, %15 : vector<8x16xf32>
      %cst_15 = arith.constant 0.707106769 : f32
      %18 = vector.broadcast %cst_15 : f32 to vector<8x16xf32>
      %19 = arith.mulf %15, %18 : vector<8x16xf32>
      %20 = math.erf %19 : vector<8x16xf32>
      %cst_16 = arith.constant 1.000000e+00 : f32
      %21 = vector.broadcast %cst_16 : f32 to vector<8x16xf32>
      %22 = arith.addf %21, %20 : vector<8x16xf32>
      %23 = arith.mulf %17, %22 : vector<8x16xf32>
      %c0_17 = arith.constant 0 : index
      %c0_18 = arith.constant 0 : index
      %24 = vector.load %arg5[%c0_17, %c0_18] : memref<1x16xf32, #tpu.memory_space<vmem>>, vector<1x16xf32>
      %25 = vector.broadcast %24 : vector<1x16xf32> to vector<8x16xf32>
      %26 = arith.mulf %23, %25 : vector<8x16xf32>
      %cst_19 = arith.constant dense<0.000000e+00> : vector<8xf32>
      %27 = vector.multi_reduction <add>, %26, %cst_19 [1] : vector<8x16xf32> to vector<8xf32>
      %28 = vector.shape_cast %27 : vector<8xf32> to vector<8x1xf32>
      %c0_20 = arith.constant 0 : index
      %c0_21 = arith.constant 0 : index
      %29 = memref.load %arg6[%c0_20, %c0_21] : memref<1x1xf32, #tpu.memory_space<smem>>
      %30 = vector.broadcast %29 : f32 to vector<8x1xf32>
      %31 = arith.addf %28, %30 : vector<8x1xf32>
      %c0_22 = arith.constant 0 : index
      %c0_23 = arith.constant 0 : index
      %32 = vector.load %arg7[%c0_22, %c0_23] : memref<8x1xf32, #tpu.memory_space<vmem>>, vector<8x1xf32>
      tpu.vector_store %arg7[%c0_22, %c0_23], %31 {strides = array<i32>} : memref<8x1xf32, #tpu.memory_space<vmem>>, vector<8x1xf32>,
    } else {
    }
    return
  }
  func.func @transform_0(%arg0: i32, %arg1: i32) -> (i32, i32) {
    %c0_i32 = arith.constant 0 : i32
    return %arg0, %arg1 : i32, i32
  }
  func.func @transform_1(%arg0: i32, %arg1: i32) -> (i32, i32) {
    %c0_i32 = arith.constant 0 : i32
    %c0_i32_0 = arith.constant 0 : i32
    return %arg1, %c0_i32 : i32, i32
  }
  func.func @transform_2(%arg0: i32, %arg1: i32) -> (i32, i32) {
    %c0_i32 = arith.constant 0 : i32
    %c0_i32_0 = arith.constant 0 : i32
    %c0_i32_1 = arith.constant 0 : i32
    return %c0_i32, %c0_i32_0 : i32, i32
  }
  func.func @transform_3(%arg0: i32, %arg1: i32) -> (i32, i32) {
    %c0_i32 = arith.constant 0 : i32
    %c0_i32_0 = arith.constant 0 : i32
    %c0_i32_1 = arith.constant 0 : i32
    return %c0_i32, %c0_i32_0 : i32, i32
  }
  func.func @transform_4(%arg0: i32, %arg1: i32) -> (i32, i32) {
    %c0_i32 = arith.constant 0 : i32
    %c0_i32_0 = arith.constant 0 : i32
    %c0_i32_1 = arith.constant 0 : i32
    return %c0_i32, %c0_i32_0 : i32, i32
  }
  func.func @transform_5(%arg0: i32, %arg1: i32) -> (i32, i32) {
    %c0_i32 = arith.constant 0 : i32
    %c0_i32_0 = arith.constant 0 : i32
    return %arg0, %c0_i32 : i32, i32
  }
}

</mosaic_0001>

<bundles_post_ra>
// kernel: tpu_custom_call.1
= control target key start
LH: loop header
LB: loop body
LE: loop exit
PB: predicated region body
PF: predicated region fallthrough
CT: control target
= control target key end

     0   :  { %vm25_vm0 = vcmask 130048   ;;  %v177_v0 = vmov 0.0|0.0   ;;  %v178_v4 = vmov 0.0   ;;  %vm179_vm1 = vmmov 0   ;;  %s240_s1 = inlined_call_operand.vmem [shape: f32[32,16], index: 1, kind: input, shape index: {}]   ;;  %s241_s0 = inlined_call_operand.vmem [shape: f32[8,32], index: 0, kind: input, shape index: {}]   ;;  %s242_s2 = inlined_call_operand.vmem [shape: f32[1,16], index: 2, kind: input, shape index: {}]   ;;  %s243_s3 = inlined_call_operand.vmem [shape: f32[1,16], index: 3, kind: input, shape index: {}]   ;;  %s244_s4 = inlined_call_operand.<no memory space> [shape: f32[1,1], index: 4, kind: input, shape index: {}]   ;;  %s245_s5 = inlined_call_operand.vmem [shape: f32[8,1], index: 5, kind: output, shape index: {}]  }
   0x1   :  { %166 = vmatprep.subr.bf16.mxu0 %v177_v0  ;;  %v29_v1 = vld [vmem:[%s240_s1] sm:$0xff]  ;;  %v30_v2 = vld [vmem:[%s240_s1 + $0x8] sm:$0xff]  ;;  %v31_v3 = vld [vmem:[%s240_s1 + $0x10] sm:$0xff]  ;;  %26 = vst.msk [vmem:[#allocation2] sm:$0xff] %vm25_vm0, %v178_v4  ;;  %163 = vmatprep.mubr.msk.f32.mxu0 %vm179_vm1, %v178_v4  ;;  %vm33_vm2 = vcmask 261120   ;;  %v139_v24 = vstv %s244_s4  ;;  %vm141_vm3 = vcmask 7168  }
   0x2   :  { %v167_v5 = vpack.c.bf16 %v30_v2, %v29_v1  ;;  %v32_v6 = vld [vmem:[%s240_s1 + $0x18] sm:$0xff]  ;;  %v28_v8 = vld [vmem:[%s241_s0] sm:$0xff] }
   0x3   :  { %v170_v7 = vpack.c.bf16 %v32_v6, %v31_v3  ;;  %v148_v13 = vld [vmem:[%s242_s2] ss:$0 sm:$0xff] }
   0x4   :  { %168 = vmatpush3.bf16.msra.mxu0 %v167_v5  ;;  %v149_v20 = vld [vmem:[%s243_s3] ss:$0 sm:$0xff] }
   0x5   :  { %169 = vmatprep.subr.bf16.mxu0 %v177_v0 }
   0x8   :  { %171 = vmatpush3.bf16.msra.mxu0 %v170_v7  ;;  %v27_v9 = vld [vmem:[#allocation2] sm:$0xff] }
   0xb   :  { %164 = vmatmul.mubr.msk.f32.vlgmr.msra.gmra.mrb[0].mxu0 %vm33_vm2, %v28_v8 }
  0xde   :  { %v103_v10 = vpop.f32.mrb[0].mxu0 }
  0xdf   :  { %v107_v11 = vadd.f32 %v103_v10, %v27_v9  ;;  %v165_v12 = vpop.f32.mrb[1].mxu0 }
  0xe1   :  { %109 = vst.msk [vmem:[#allocation2] sm:$0xff] %vm25_vm0, %v107_v11 }
  0xe8   :  { %v113_v14 = vld [vmem:[#allocation2] sm:$0xff] }
  0xe9   :  { %v121_v15 = vadd.f32 %v148_v13, %v113_v14 }
  0xeb   :  { %v123_v16 = vmul.f32 0.70710677, %v121_v15  ;;  %v122_v18 = vmul.f32 0.5, %v121_v15 }
  0xed   :  { %175 = verf.f32 %v123_v16 }
  0xf7   :  { %v176_v17 = vpop.eup %175 }
  0xf8   :  { %v125_v19 = vadd.f32 1.0, %v176_v17 }
  0xfa   :  { %v126_v21 = vmul.f32 %v125_v19, %v122_v18 }
  0xfc   :  { %v134_v22 = vmul.f32 %v149_v20, %v126_v21 }
  0xfe   :  { %v135_v23 = vsel %vm25_vm0, %v134_v22, 0.0 }
  0xff   :  { %136 = vadd.xlane.f32.xlu0 %v135_v23 }
 0x18c   :  { %v137_v25 = vpop.xlane.xlu0 %136 }
 0x18d   :  { %v140_v26 = vadd.f32 %v139_v24, %v137_v25 }
 0x18f   :  { %142 = vst.msk [vmem:[%s245_s5] sm:$0xff] %vm141_vm3, %v140_v26 }

</bundles_post_ra>
